<compile_context>
chip_gen: v5e
topology: v5e:2x2
jax: 0.10.0
libtpu: 0.0.40
codegen_flags: <defaults>
</compile_context>

<pallas_src>
import functools

import jax
import jax.numpy as jnp
from jax.experimental import pallas as pl
from jax.experimental.pallas import tpu as pltpu

HIDDEN = 128
LANE = 128
LN_EPS = 1e-5  # PyTorch nn.LayerNorm default


def _round_up(x, m):
    return (x + m - 1) // m * m


def _cdiv(a, b):
    return (a + b - 1) // b


def _num_parallel_cores():
    """TensorCores a single Pallas 'parallel' grid axis can shard over."""
    try:
        kind = jax.devices()[0].device_kind.lower()
    except Exception:
        return 1
    for tag in ("v4", "v5p", "7"):   # megacore chips / v7x (2 TC per device)
        if tag in kind:
            return 2
    return 1


def mlp_deep_kernel(num_blocks, k_rem, tk,
                    x_ref, w1_ref, vec_ref, wb_ref, wo_ref, bo_ref,
                    o_ref, acc_ref):
    k = pl.program_id(1)
    nk = pl.num_programs(1)

    @pl.when(k == 0)
    def _():
        acc_ref[...] = jnp.zeros_like(acc_ref)

    x = x_ref[...]
    if k_rem != 0:
        # x streams unpadded from HBM, so the tail columns of the last K tile
        # hold undefined data.  Mask them to zero explicitly (0 * garbage can
        # be NaN, so zero-padded w1 rows alone would not be safe).
        lane = jax.lax.broadcasted_iota(jnp.int32, x.shape, 1)
        limit = jnp.where(k == nk - 1, k_rem, tk)
        x = jnp.where(lane < limit, x, 0.0)

    # K-tiled first linear: accumulate x_tile @ w1_tile on the MXU (f32 acc).
    acc_ref[...] += jnp.dot(x, w1_ref[...], preferred_element_type=jnp.float32)

    @pl.when(k == nk - 1)
    def _():
        nb = num_blocks
        # vec_ref layout: row 0 = b1, rows [1,1+nb) = bb,
        #                 rows [1+nb,1+2nb) = gamma, rows [1+2nb,1+3nb) = beta.
        h = jnp.maximum(acc_ref[...] + vec_ref[0:1, :], 0.0)
        inv_n = 1.0 / HIDDEN
        # Hidden blocks: Linear -> LayerNorm -> ReLU (static unroll, few blocks).
        for i in range(nb):
            z = jnp.dot(h, wb_ref[i], preferred_element_type=jnp.float32)
            z = z + vec_ref[1 + i:2 + i, :]
            # Two-pass LayerNorm stats (torch parity; no E[z^2]-mean^2 cancellation).
            mean = jnp.sum(z, axis=-1, keepdims=True) * inv_n
            d = z - mean
            var = jnp.sum(d * d, axis=-1, keepdims=True) * inv_n
            zn = d * jax.lax.rsqrt(var + LN_EPS)
            g = vec_ref[1 + nb + i:2 + nb + i, :]
            be = vec_ref[1 + 2 * nb + i:2 + 2 * nb + i, :]
            h = jnp.maximum(zn * g + be, 0.0)
        # Output linear into a lane-dense (TB, nc_pad) slab.
        out = jnp.dot(h, wo_ref[...], preferred_element_type=jnp.float32)
        o_ref[...] = (out + bo_ref[...]).astype(o_ref.dtype)


def mlp_classifier_deep(x, params, *, num_classes):
    """x: (b, 3, H, W) float32; returns (b, num_classes) float32 logits."""
    b = x.shape[0]
    x_flat = x.reshape(b, -1)          # free row-major reshape, == torch .view(b, -1)
    input_size = x_flat.shape[1]

    (w1, b1, wb, bb, gamma, beta, wo, bo) = params
    num_blocks = wb.shape[0]

    # ---- chip-aware budgets ---------------------------------------------
    try:
        info = pltpu.get_tpu_info()
        phys_vmem = int(getattr(info, "vmem_capacity_bytes", 64 * 1024 * 1024))
    except Exception:
        phys_vmem = 64 * 1024 * 1024
    vmem_cap = int(phys_vmem * 0.85)   # headroom for compiler scratch / DMA descriptors
    big_vmem = phys_vmem >= 100 * 1024 * 1024   # v5e/v6e (128 MiB); v7x is 64 MiB

    # ---- tile sizes --------------------------------------------------------
    # K tile over the flattened-image feature axis (bigger on 128 MiB parts:
    # fewer, larger DMAs amortize per-grid-step overhead).
    TK_CAP = 4096 if big_vmem else 2048
    TK = min(TK_CAP, _round_up(input_size, LANE))
    k_pad = _round_up(input_size, TK)
    grid_k = k_pad // TK
    k_rem = input_size % TK            # 0 => no in-kernel tail masking emitted

    # Batch tile: large to cut w1 re-streaming, but keep >= 2 tiles when the
    # device has 2 TensorCores so the "parallel" axis actually shards.
    b_ceil = _round_up(b, 8)
    n_cores = _num_parallel_cores()
    if b_ceil <= 8:
        TB = b_ceil
    else:
        TB = min(1024, b_ceil)
        if n_cores > 1:
            TB = min(TB, _round_up(_cdiv(b_ceil, n_cores), 8))
    grid_b = _cdiv(b, TB)

    nc_pad = _round_up(num_classes, LANE)   # lane-dense output width

    # ---- only the small weights get padded copies (x streams as-is) -------
    if k_pad == input_size:
        w1_p = w1
    else:
        w1_p = jnp.zeros((k_pad, HIDDEN), jnp.float32).at[:input_size, :].set(w1)
    if nc_pad == num_classes:
        wo_p = wo
        bo_p = bo.reshape(1, num_classes)
    else:
        wo_p = jnp.zeros((HIDDEN, nc_pad), jnp.float32).at[:, :num_classes].set(wo)
        bo_p = jnp.zeros((1, nc_pad), jnp.float32).at[:, :num_classes].set(bo.reshape(1, -1))

    # Pack all HIDDEN-wide vectors into one lane-dense slab (fewer DMAs,
    # no per-(1,128)-row sublane-padding waste).
    vec_slab = jnp.concatenate(
        [b1.reshape(1, HIDDEN),
         bb.reshape(num_blocks, HIDDEN),
         gamma.reshape(num_blocks, HIDDEN),
         beta.reshape(num_blocks, HIDDEN)], axis=0)
    vec_rows = vec_slab.shape[0]

    grid = (grid_b, grid_k)

    in_specs = [
        pl.BlockSpec((TB, TK), lambda i, k: (i, k)),                        # x tile (streamed)
        pl.BlockSpec((TK, HIDDEN), lambda i, k: (k, 0)),                    # w1 K-tile
        pl.BlockSpec((vec_rows, HIDDEN), lambda i, k: (0, 0)),              # packed b1/bb/gamma/beta
        pl.BlockSpec((num_blocks, HIDDEN, HIDDEN), lambda i, k: (0, 0, 0)),  # wb stack
        pl.BlockSpec((HIDDEN, nc_pad), lambda i, k: (0, 0)),                # wo (lane-padded)
        pl.BlockSpec((1, nc_pad), lambda i, k: (0, 0)),                     # bo (lane-padded)
    ]
    out_spec = pl.BlockSpec((TB, nc_pad), lambda i, k: (i, 0))

    flops = 2 * b * (input_size * HIDDEN
                     + num_blocks * HIDDEN * HIDDEN
                     + HIDDEN * nc_pad)
    bytes_accessed = 4 * (b * input_size                 # dominant x stream
                          + grid_b * k_pad * HIDDEN      # w1 restream per batch tile
                          + num_blocks * HIDDEN * HIDDEN
                          + vec_rows * HIDDEN + HIDDEN * nc_pad + nc_pad
                          + b * nc_pad)
    cost = pl.CostEstimate(flops=flops,
                           transcendentals=num_blocks * b,
                           bytes_accessed=bytes_accessed)

    # VMEM budget: double-buffered x / w1 / out tiles + resident small weights
    # + f32 accumulator, capped below the chip's physical VMEM with headroom.
    vmem_need = 4 * (2 * TB * TK
                     + 2 * TK * HIDDEN
                     + 2 * TB * nc_pad
                     + TB * HIDDEN
                     + 2 * (vec_rows * HIDDEN
                            + num_blocks * HIDDEN * HIDDEN
                            + HIDDEN * nc_pad + nc_pad))
    vmem_limit = min(max(vmem_need * 3 // 2, 32 * 1024 * 1024), vmem_cap)

    kernel = functools.partial(mlp_deep_kernel, num_blocks, k_rem, TK)

    out_padded = pl.pallas_call(
        kernel,
        out_shape=jax.ShapeDtypeStruct((b, nc_pad), jnp.float32),
        grid=grid,
        in_specs=in_specs,
        out_specs=out_spec,
        scratch_shapes=[pltpu.VMEM((TB, HIDDEN), jnp.float32)],
        compiler_params=pltpu.CompilerParams(
            dimension_semantics=("parallel", "arbitrary"),
            vmem_limit_bytes=vmem_limit),
        cost_estimate=cost,
    )(x_flat, w1_p, vec_slab, wb, wo_p, bo_p)

    return out_padded[:, :num_classes]


def init_params(key, input_size, hidden_dim, num_classes, num_layers):
    """Deterministic init mimicking PyTorch default Linear init U(-k,k), k=1/sqrt(fan_in)."""
    ks = jax.random.split(key, 8)
    num_blocks = num_layers - 1

    def lin(kw, kb, fan_in, fan_out, leading=()):
        bound = 1.0 / jnp.sqrt(fan_in)
        w = jax.random.uniform(kw, leading + (fan_in, fan_out), jnp.float32, -bound, bound)
        b = jax.random.uniform(kb, leading + (1, fan_out), jnp.float32, -bound, bound)
        return w, b

    w1, b1 = lin(ks[0], ks[1], input_size, hidden_dim)
    wb, bb = lin(ks[2], ks[3], hidden_dim, hidden_dim, leading=(num_blocks,))
    gamma = jnp.ones((num_blocks, 1, hidden_dim), jnp.float32)   # LayerNorm weight
    beta = jnp.zeros((num_blocks, 1, hidden_dim), jnp.float32)   # LayerNorm bias
    wo, bo = lin(ks[4], ks[5], hidden_dim, num_classes)
    return (w1, b1, wb, bb, gamma, beta, wo, bo)


def reference_forward(x, params):
    """Pure-JAX reference (same math) for a correctness check."""
    (w1, b1, wb, bb, gamma, beta, wo, bo) = params
    h = x.reshape(x.shape[0], -1) @ w1 + b1
    h = jnp.maximum(h, 0.0)
    for i in range(wb.shape[0]):
        z = h @ wb[i] + bb[i]
        mean = jnp.mean(z, axis=-1, keepdims=True)
        var = jnp.mean((z - mean) ** 2, axis=-1, keepdims=True)
        z = (z - mean) / jnp.sqrt(var + LN_EPS)
        z = z * gamma[i] + beta[i]
        h = jnp.maximum(z, 0.0)
    return h @ wo + bo


if __name__ == "__main__":
    # Small shapes consistent with the module's forward: (b, 3, H, W)
    B, H, W = 2, 16, 16
    NUM_CLASSES = 6
    NUM_LAYERS = 4
    INPUT_SIZE = 3 * H * W

    key = jax.random.PRNGKey(0)
    kx, kp = jax.random.split(key)
    x = jax.random.normal(kx, (B, 3, H, W), jnp.float32)
    params = init_params(kp, INPUT_SIZE, HIDDEN, NUM_CLASSES, NUM_LAYERS)

    logits = mlp_classifier_deep(x, params, num_classes=NUM_CLASSES)
    logits = jax.block_until_ready(logits)

    ref = reference_forward(x, params)
    assert logits.shape == (B, NUM_CLASSES)
    assert jnp.allclose(logits, ref, atol=1e-4, rtol=1e-4)
    print("KERNEL_OK")
</pallas_src>

<mosaic_0001>
module attributes {stable_mosaic.version = 11 : i64} {
  func.func @mlp_deep_kernel(%arg0: i32, %arg1: i32, %arg2: memref<8x768xf32, #tpu.memory_space<vmem>>, %arg3: memref<768x128xf32, #tpu.memory_space<vmem>>, %arg4: memref<10x128xf32, #tpu.memory_space<vmem>>, %arg5: memref<3x128x128xf32, #tpu.memory_space<vmem>>, %arg6: memref<128x128xf32, #tpu.memory_space<vmem>>, %arg7: memref<1x128xf32, #tpu.memory_space<vmem>>, %arg8: memref<8x128xf32, #tpu.memory_space<vmem>>, %arg9: memref<8x128xf32, #tpu.memory_space<vmem>>) attributes {dimension_semantics = [#tpu.dimension_semantics<parallel>, #tpu.dimension_semantics<arbitrary>], iteration_bounds = array<i64: 1, 1>, scalar_prefetch = 0 : i64, scratch_operands = 1 : i64, tpu.core_type = #tpu.core_type<tc>, window_params = [{transform_indices = @transform_0, window_bounds = array<i64: 8, 768>}, {transform_indices = @transform_1, window_bounds = array<i64: 768, 128>}, {pipeline_mode = #tpu.pipeline_mode<synchronous>, transform_indices = @transform_2, window_bounds = array<i64: 10, 128>}, {pipeline_mode = #tpu.pipeline_mode<synchronous>, transform_indices = @transform_3, window_bounds = array<i64: 3, 128, 128>}, {pipeline_mode = #tpu.pipeline_mode<synchronous>, transform_indices = @transform_4, window_bounds = array<i64: 128, 128>}, {pipeline_mode = #tpu.pipeline_mode<synchronous>, transform_indices = @transform_5, window_bounds = array<i64: 1, 128>}, {transform_indices = @transform_6, window_bounds = array<i64: 8, 128>}]} {
    %c0_i32 = arith.constant 0 : i32
    %0 = arith.cmpi eq, %arg1, %c0_i32 : i32
    %1 = arith.extui %0 : i1 to i32
    %c0_i32_0 = arith.constant 0 : i32
    %2 = arith.cmpi ne, %1, %c0_i32_0 : i32
    scf.if %2 {
      %cst_10 = arith.constant 0.000000e+00 : f32
      %12 = vector.broadcast %cst_10 : f32 to vector<8x128xf32>
      %c0_11 = arith.constant 0 : index
      %c0_12 = arith.constant 0 : index
      %13 = vector.load %arg9[%c0_11, %c0_12] : memref<8x128xf32, #tpu.memory_space<vmem>>, vector<8x128xf32>
      tpu.vector_store %arg9[%c0_11, %c0_12], %12 {strides = array<i32>} : memref<8x128xf32, #tpu.memory_space<vmem>>, vector<8x128xf32>,
    } else {
    }
    %c0 = arith.constant 0 : index
    %c0_1 = arith.constant 0 : index
    %3 = vector.load %arg2[%c0, %c0_1] : memref<8x768xf32, #tpu.memory_space<vmem>>, vector<8x768xf32>
    %c0_2 = arith.constant 0 : index
    %c0_3 = arith.constant 0 : index
    %4 = vector.load %arg9[%c0_2, %c0_3] : memref<8x128xf32, #tpu.memory_space<vmem>>, vector<8x128xf32>
    %c0_4 = arith.constant 0 : index
    %c0_5 = arith.constant 0 : index
    %5 = vector.load %arg3[%c0_4, %c0_5] : memref<768x128xf32, #tpu.memory_space<vmem>>, vector<768x128xf32>
    %cst = arith.constant dense<0.000000e+00> : vector<8x128xf32>
    %6 = tpu.matmul %3, %5, %cst {dimension_numbers = #tpu.dot_dimension_numbers<[1], [0], [0], [1], [0, 0, 1, 1], [], []>} : vector<8x768xf32>, vector<768x128xf32>, vector<8x128xf32> -> vector<8x128xf32>
    %7 = arith.addf %4, %6 : vector<8x128xf32>
    %c0_6 = arith.constant 0 : index
    %c0_7 = arith.constant 0 : index
    %8 = vector.load %arg9[%c0_6, %c0_7] : memref<8x128xf32, #tpu.memory_space<vmem>>, vector<8x128xf32>
    tpu.vector_store %arg9[%c0_6, %c0_7], %7 {strides = array<i32>} : memref<8x128xf32, #tpu.memory_space<vmem>>, vector<8x128xf32>,
    %c0_i32_8 = arith.constant 0 : i32
    %9 = arith.cmpi eq, %arg1, %c0_i32_8 : i32
    %10 = arith.extui %9 : i1 to i32
    %c0_i32_9 = arith.constant 0 : i32
    %11 = arith.cmpi ne, %10, %c0_i32_9 : i32
    scf.if %11 {
      %c0_10 = arith.constant 0 : index
      %c0_11 = arith.constant 0 : index
      %12 = vector.load %arg9[%c0_10, %c0_11] : memref<8x128xf32, #tpu.memory_space<vmem>>, vector<8x128xf32>
      %c0_12 = arith.constant 0 : index
      %c0_13 = arith.constant 0 : index
      %13 = vector.load %arg4[%c0_12, %c0_13] : memref<10x128xf32, #tpu.memory_space<vmem>>, vector<1x128xf32>
      %14 = vector.broadcast %13 : vector<1x128xf32> to vector<8x128xf32>
      %15 = arith.addf %12, %14 : vector<8x128xf32>
      %cst_14 = arith.constant 0.000000e+00 : f32
      %16 = vector.broadcast %cst_14 : f32 to vector<8x128xf32>
      %17 = arith.maximumf %15, %16 : vector<8x128xf32>
      %c0_15 = arith.constant 0 : index
      %c0_16 = arith.constant 0 : index
      %c0_17 = arith.constant 0 : index
      %18 = vector.load %arg5[%c0_15, %c0_16, %c0_17] : memref<3x128x128xf32, #tpu.memory_space<vmem>>, vector<1x128x128xf32>
      %19 = vector.shape_cast %18 : vector<1x128x128xf32> to vector<128x128xf32>
      %cst_18 = arith.constant dense<0.000000e+00> : vector<8x128xf32>
      %20 = tpu.matmul %17, %19, %cst_18 {dimension_numbers = #tpu.dot_dimension_numbers<[1], [0], [0], [1], [0, 0, 1, 1], [], []>} : vector<8x128xf32>, vector<128x128xf32>, vector<8x128xf32> -> vector<8x128xf32>
      %c1 = arith.constant 1 : index
      %c0_19 = arith.constant 0 : index
      %21 = vector.load %arg4[%c1, %c0_19] : memref<10x128xf32, #tpu.memory_space<vmem>>, vector<1x128xf32>
      %22 = vector.broadcast %21 : vector<1x128xf32> to vector<8x128xf32>
      %23 = arith.addf %20, %22 : vector<8x128xf32>
      %cst_20 = arith.constant dense<0.000000e+00> : vector<8xf32>
      %24 = vector.multi_reduction <add>, %23, %cst_20 [1] : vector<8x128xf32> to vector<8xf32>
      %25 = vector.shape_cast %24 : vector<8xf32> to vector<8x1xf32>
      %cst_21 = arith.constant 7.812500e-03 : f32
      %26 = vector.broadcast %cst_21 : f32 to vector<8x1xf32>
      %27 = arith.mulf %25, %26 : vector<8x1xf32>
      %28 = vector.broadcast %27 : vector<8x1xf32> to vector<8x128xf32>
      %29 = arith.subf %23, %28 : vector<8x128xf32>
      %30 = arith.mulf %29, %29 : vector<8x128xf32>
      %cst_22 = arith.constant dense<0.000000e+00> : vector<8xf32>
      %31 = vector.multi_reduction <add>, %30, %cst_22 [1] : vector<8x128xf32> to vector<8xf32>
      %32 = vector.shape_cast %31 : vector<8xf32> to vector<8x1xf32>
      %cst_23 = arith.constant 7.812500e-03 : f32
      %33 = vector.broadcast %cst_23 : f32 to vector<8x1xf32>
      %34 = arith.mulf %32, %33 : vector<8x1xf32>
      %cst_24 = arith.constant 9.99999974E-6 : f32
      %35 = vector.broadcast %cst_24 : f32 to vector<8x1xf32>
      %36 = arith.addf %34, %35 : vector<8x1xf32>
      %37 = math.rsqrt %36 : vector<8x1xf32>
      %38 = vector.broadcast %37 : vector<8x1xf32> to vector<8x128xf32>
      %39 = arith.mulf %29, %38 : vector<8x128xf32>
      %c4 = arith.constant 4 : index
      %c0_25 = arith.constant 0 : index
      %40 = vector.load %arg4[%c4, %c0_25] : memref<10x128xf32, #tpu.memory_space<vmem>>, vector<1x128xf32>
      %c7 = arith.constant 7 : index
      %c0_26 = arith.constant 0 : index
      %41 = vector.load %arg4[%c7, %c0_26] : memref<10x128xf32, #tpu.memory_space<vmem>>, vector<1x128xf32>
      %42 = vector.broadcast %40 : vector<1x128xf32> to vector<8x128xf32>
      %43 = arith.mulf %39, %42 : vector<8x128xf32>
      %44 = vector.broadcast %41 : vector<1x128xf32> to vector<8x128xf32>
      %45 = arith.addf %43, %44 : vector<8x128xf32>
      %cst_27 = arith.constant 0.000000e+00 : f32
      %46 = vector.broadcast %cst_27 : f32 to vector<8x128xf32>
      %47 = arith.maximumf %45, %46 : vector<8x128xf32>
      %c1_28 = arith.constant 1 : index
      %c0_29 = arith.constant 0 : index
      %c0_30 = arith.constant 0 : index
      %48 = vector.load %arg5[%c1_28, %c0_29, %c0_30] : memref<3x128x128xf32, #tpu.memory_space<vmem>>, vector<1x128x128xf32>
      %49 = vector.shape_cast %48 : vector<1x128x128xf32> to vector<128x128xf32>
      %cst_31 = arith.constant dense<0.000000e+00> : vector<8x128xf32>
      %50 = tpu.matmul %47, %49, %cst_31 {dimension_numbers = #tpu.dot_dimension_numbers<[1], [0], [0], [1], [0, 0, 1, 1], [], []>} : vector<8x128xf32>, vector<128x128xf32>, vector<8x128xf32> -> vector<8x128xf32>
      %c2 = arith.constant 2 : index
      %c0_32 = arith.constant 0 : index
      %51 = vector.load %arg4[%c2, %c0_32] : memref<10x128xf32, #tpu.memory_space<vmem>>, vector<1x128xf32>
      %52 = vector.broadcast %51 : vector<1x128xf32> to vector<8x128xf32>
      %53 = arith.addf %50, %52 : vector<8x128xf32>
      %cst_33 = arith.constant dense<0.000000e+00> : vector<8xf32>
      %54 = vector.multi_reduction <add>, %53, %cst_33 [1] : vector<8x128xf32> to vector<8xf32>
      %55 = vector.shape_cast %54 : vector<8xf32> to vector<8x1xf32>
      %cst_34 = arith.constant 7.812500e-03 : f32
      %56 = vector.broadcast %cst_34 : f32 to vector<8x1xf32>
      %57 = arith.mulf %55, %56 : vector<8x1xf32>
      %58 = vector.broadcast %57 : vector<8x1xf32> to vector<8x128xf32>
      %59 = arith.subf %53, %58 : vector<8x128xf32>
      %60 = arith.mulf %59, %59 : vector<8x128xf32>
      %cst_35 = arith.constant dense<0.000000e+00> : vector<8xf32>
      %61 = vector.multi_reduction <add>, %60, %cst_35 [1] : vector<8x128xf32> to vector<8xf32>
      %62 = vector.shape_cast %61 : vector<8xf32> to vector<8x1xf32>
      %cst_36 = arith.constant 7.812500e-03 : f32
      %63 = vector.broadcast %cst_36 : f32 to vector<8x1xf32>
      %64 = arith.mulf %62, %63 : vector<8x1xf32>
      %cst_37 = arith.constant 9.99999974E-6 : f32
      %65 = vector.broadcast %cst_37 : f32 to vector<8x1xf32>
      %66 = arith.addf %64, %65 : vector<8x1xf32>
      %67 = math.rsqrt %66 : vector<8x1xf32>
      %68 = vector.broadcast %67 : vector<8x1xf32> to vector<8x128xf32>
      %69 = arith.mulf %59, %68 : vector<8x128xf32>
      %c5 = arith.constant 5 : index
      %c0_38 = arith.constant 0 : index
      %70 = vector.load %arg4[%c5, %c0_38] : memref<10x128xf32, #tpu.memory_space<vmem>>, vector<1x128xf32>
      %c8 = arith.constant 8 : index
      %c0_39 = arith.constant 0 : index
      %71 = vector.load %arg4[%c8, %c0_39] : memref<10x128xf32, #tpu.memory_space<vmem>>, vector<1x128xf32>
      %72 = vector.broadcast %70 : vector<1x128xf32> to vector<8x128xf32>
      %73 = arith.mulf %69, %72 : vector<8x128xf32>
      %74 = vector.broadcast %71 : vector<1x128xf32> to vector<8x128xf32>
      %75 = arith.addf %73, %74 : vector<8x128xf32>
      %cst_40 = arith.constant 0.000000e+00 : f32
      %76 = vector.broadcast %cst_40 : f32 to vector<8x128xf32>
      %77 = arith.maximumf %75, %76 : vector<8x128xf32>
      %c2_41 = arith.constant 2 : index
      %c0_42 = arith.constant 0 : index
      %c0_43 = arith.constant 0 : index
      %78 = vector.load %arg5[%c2_41, %c0_42, %c0_43] : memref<3x128x128xf32, #tpu.memory_space<vmem>>, vector<1x128x128xf32>
      %79 = vector.shape_cast %78 : vector<1x128x128xf32> to vector<128x128xf32>
      %cst_44 = arith.constant dense<0.000000e+00> : vector<8x128xf32>
      %80 = tpu.matmul %77, %79, %cst_44 {dimension_numbers = #tpu.dot_dimension_numbers<[1], [0], [0], [1], [0, 0, 1, 1], [], []>} : vector<8x128xf32>, vector<128x128xf32>, vector<8x128xf32> -> vector<8x128xf32>
      %c3 = arith.constant 3 : index
      %c0_45 = arith.constant 0 : index
      %81 = vector.load %arg4[%c3, %c0_45] : memref<10x128xf32, #tpu.memory_space<vmem>>, vector<1x128xf32>
      %82 = vector.broadcast %81 : vector<1x128xf32> to vector<8x128xf32>
      %83 = arith.addf %80, %82 : vector<8x128xf32>
      %cst_46 = arith.constant dense<0.000000e+00> : vector<8xf32>
      %84 = vector.multi_reduction <add>, %83, %cst_46 [1] : vector<8x128xf32> to vector<8xf32>
      %85 = vector.shape_cast %84 : vector<8xf32> to vector<8x1xf32>
      %cst_47 = arith.constant 7.812500e-03 : f32
      %86 = vector.broadcast %cst_47 : f32 to vector<8x1xf32>
      %87 = arith.mulf %85, %86 : vector<8x1xf32>
      %88 = vector.broadcast %87 : vector<8x1xf32> to vector<8x128xf32>
      %89 = arith.subf %83, %88 : vector<8x128xf32>
      %90 = arith.mulf %89, %89 : vector<8x128xf32>
      %cst_48 = arith.constant dense<0.000000e+00> : vector<8xf32>
      %91 = vector.multi_reduction <add>, %90, %cst_48 [1] : vector<8x128xf32> to vector<8xf32>
      %92 = vector.shape_cast %91 : vector<8xf32> to vector<8x1xf32>
      %cst_49 = arith.constant 7.812500e-03 : f32
      %93 = vector.broadcast %cst_49 : f32 to vector<8x1xf32>
      %94 = arith.mulf %92, %93 : vector<8x1xf32>
      %cst_50 = arith.constant 9.99999974E-6 : f32
      %95 = vector.broadcast %cst_50 : f32 to vector<8x1xf32>
      %96 = arith.addf %94, %95 : vector<8x1xf32>
      %97 = math.rsqrt %96 : vector<8x1xf32>
      %98 = vector.broadcast %97 : vector<8x1xf32> to vector<8x128xf32>
      %99 = arith.mulf %89, %98 : vector<8x128xf32>
      %c6 = arith.constant 6 : index
      %c0_51 = arith.constant 0 : index
      %100 = vector.load %arg4[%c6, %c0_51] : memref<10x128xf32, #tpu.memory_space<vmem>>, vector<1x128xf32>
      %c9 = arith.constant 9 : index
      %c0_52 = arith.constant 0 : index
      %101 = vector.load %arg4[%c9, %c0_52] : memref<10x128xf32, #tpu.memory_space<vmem>>, vector<1x128xf32>
      %102 = vector.broadcast %100 : vector<1x128xf32> to vector<8x128xf32>
      %103 = arith.mulf %99, %102 : vector<8x128xf32>
      %104 = vector.broadcast %101 : vector<1x128xf32> to vector<8x128xf32>
      %105 = arith.addf %103, %104 : vector<8x128xf32>
      %cst_53 = arith.constant 0.000000e+00 : f32
      %106 = vector.broadcast %cst_53 : f32 to vector<8x128xf32>
      %107 = arith.maximumf %105, %106 : vector<8x128xf32>
      %c0_54 = arith.constant 0 : index
      %c0_55 = arith.constant 0 : index
      %108 = vector.load %arg6[%c0_54, %c0_55] : memref<128x128xf32, #tpu.memory_space<vmem>>, vector<128x128xf32>
      %cst_56 = arith.constant dense<0.000000e+00> : vector<8x128xf32>
      %109 = tpu.matmul %107, %108, %cst_56 {dimension_numbers = #tpu.dot_dimension_numbers<[1], [0], [0], [1], [0, 0, 1, 1], [], []>} : vector<8x128xf32>, vector<128x128xf32>, vector<8x128xf32> -> vector<8x128xf32>
      %c0_57 = arith.constant 0 : index
      %c0_58 = arith.constant 0 : index
      %110 = vector.load %arg7[%c0_57, %c0_58] : memref<1x128xf32, #tpu.memory_space<vmem>>, vector<1x128xf32>
      %111 = vector.broadcast %110 : vector<1x128xf32> to vector<8x128xf32>
      %112 = arith.addf %109, %111 : vector<8x128xf32>
      %c0_59 = arith.constant 0 : index
      %c0_60 = arith.constant 0 : index
      %113 = vector.load %arg8[%c0_59, %c0_60] : memref<8x128xf32, #tpu.memory_space<vmem>>, vector<8x128xf32>
      tpu.vector_store %arg8[%c0_59, %c0_60], %112 {strides = array<i32>} : memref<8x128xf32, #tpu.memory_space<vmem>>, vector<8x128xf32>,
    } else {
    }
    return
  }
  func.func @transform_0(%arg0: i32, %arg1: i32) -> (i32, i32) {
    %c0_i32 = arith.constant 0 : i32
    return %arg0, %arg1 : i32, i32
  }
  func.func @transform_1(%arg0: i32, %arg1: i32) -> (i32, i32) {
    %c0_i32 = arith.constant 0 : i32
    %c0_i32_0 = arith.constant 0 : i32
    return %arg1, %c0_i32 : i32, i32
  }
  func.func @transform_2(%arg0: i32, %arg1: i32) -> (i32, i32) {
    %c0_i32 = arith.constant 0 : i32
    %c0_i32_0 = arith.constant 0 : i32
    %c0_i32_1 = arith.constant 0 : i32
    return %c0_i32, %c0_i32_0 : i32, i32
  }
  func.func @transform_3(%arg0: i32, %arg1: i32) -> (i32, i32, i32) {
    %c0_i32 = arith.constant 0 : i32
    %c0_i32_0 = arith.constant 0 : i32
    %c0_i32_1 = arith.constant 0 : i32
    %c0_i32_2 = arith.constant 0 : i32
    return %c0_i32, %c0_i32_0, %c0_i32_1 : i32, i32, i32
  }
  func.func @transform_4(%arg0: i32, %arg1: i32) -> (i32, i32) {
    %c0_i32 = arith.constant 0 : i32
    %c0_i32_0 = arith.constant 0 : i32
    %c0_i32_1 = arith.constant 0 : i32
    return %c0_i32, %c0_i32_0 : i32, i32
  }
  func.func @transform_5(%arg0: i32, %arg1: i32) -> (i32, i32) {
    %c0_i32 = arith.constant 0 : i32
    %c0_i32_0 = arith.constant 0 : i32
    %c0_i32_1 = arith.constant 0 : i32
    return %c0_i32, %c0_i32_0 : i32, i32
  }
  func.func @transform_6(%arg0: i32, %arg1: i32) -> (i32, i32) {
    %c0_i32 = arith.constant 0 : i32
    %c0_i32_0 = arith.constant 0 : i32
    return %arg0, %c0_i32 : i32, i32
  }
}

</mosaic_0001>

<bundles_post_ra>
// kernel: tpu_custom_call.1
= control target key start
LH: loop header
LB: loop body
LE: loop exit
PB: predicated region body
PF: predicated region fallthrough
CT: control target
= control target key end

     0   :  { %11 = vsyncpa [#allocation4], 0  ;;  %s897_s0 = inlined_call_operand.hbm [shape: f32[2,768], index: 0, kind: input, shape index: {}]   ;;  %s898_s1 = inlined_call_operand.hbm [shape: f32[768,128], index: 1, kind: input, shape index: {}]   ;;  %s899_s2 = inlined_call_operand.hbm [shape: f32[10,128], index: 2, kind: input, shape index: {}]   ;;  %s900_s3 = inlined_call_operand.hbm [shape: f32[3,128,128], index: 3, kind: input, shape index: {}]   ;;  %s901_s4 = inlined_call_operand.hbm [shape: f32[128,128], index: 4, kind: input, shape index: {}]   ;;  %s902_s5 = inlined_call_operand.vmem [shape: f32[1,128], index: 5, kind: input, shape index: {}]   ;;  %s903_s6 = inlined_call_operand.hbm [shape: f32[2,128], index: 6, kind: output, shape index: {}]  }
   0x1   :  { %12 = vsyncpa [#allocation7], 0 }
   0x2   :  { %13 = vsyncpa [#allocation10], 0 }
   0x3   :  { %14 = vsyncpa [#allocation5], 0  ;;  %s32_s23 = sshll.u32 %s898_s1, 4  ;;  %s33_s23 = int_to_ptr.hbm [resolvable:$true] %s32_s23 }
   0x4   :  { %18 = vsyncadd [#allocation4], 576  ;;  %s817_s24 = smov [#allocation6]   ;;  %s58_s28 = sshll.u32 %s900_s3, 4  ;;  %s59_s28 = int_to_ptr.hbm [resolvable:$true] %s58_s28 }
   0x5   :  { %s34_s25 = sshll.u32 %s817_s24, 4  ;;  %s818_s29 = smov 128   ;;  %s35_s25 = int_to_ptr.vmem [resolvable:$true] %s34_s25 }
   0x6   :  { %s819_s30 = smov 8   ;;  %s820_s7 = smov [#allocation9]  }
   0x7   :  { %40 = dma.hbm_to_vmem [thread:$0]  %s33_s23, 12288, %s35_s25, [#allocation7], %s818_s29, %s818_s29, %s819_s30  }
   0x8   :  { %s60_s8 = sshll.u32 %s820_s7, 4  ;;  %s19_s10 = sshll.u32 %s897_s0, 4  ;;  %s61_s8 = int_to_ptr.vmem [resolvable:$true] %s60_s8  ;;  %s20_s10 = int_to_ptr.hbm [resolvable:$true] %s19_s10 }
   0x9   :  { %66 = dma.hbm_to_vmem [thread:$0]  %s59_s28, 6144, %s61_s8, [#allocation10], %s818_s29, %s818_s29, %s819_s30  }
   0xa   :  { %s821_s3 = smov [#allocation3]   ;;  %s45_s14 = sshll.u32 %s899_s2, 4  ;;  %s46_s14 = int_to_ptr.hbm [resolvable:$true] %s45_s14 }
   0xb   :  { %s21_s11 = sshll.u32 %s821_s3, 4  ;;  %s822_s15 = smov 192   ;;  %s22_s11 = int_to_ptr.vmem [resolvable:$true] %s21_s11 }
   0xc   :  { %s823_s16 = smov 12   ;;  %s824_s17 = smov [#allocation8]  }
   0xd   :  { %27 = dma.hbm_to_vmem [thread:$0]  %s20_s10, 192, %s22_s11, [#allocation4], %s822_s15, %s822_s15, %s823_s16  }
   0xe   :  { %s47_s18 = sshll.u32 %s824_s17, 4  ;;  %s71_s20 = sshll.u32 %s901_s4, 4  ;;  %s48_s18 = int_to_ptr.vmem [resolvable:$true] %s47_s18  ;;  %s72_s20 = int_to_ptr.hbm [resolvable:$true] %s71_s20 }
   0xf   :  { %53 = dma.hbm_to_vmem [thread:$0]  %s46_s14, 256, %s48_s18, [#allocation7], %s818_s29, %s818_s29, %s819_s30  }
  0x10   :  { %s825_s21 = smov [#allocation11]  }
  0x11   :  { %s73_s22 = sshll.u32 %s825_s21, 4  ;;  %s74_s22 = int_to_ptr.vmem [resolvable:$true] %s73_s22 }
  0x12   :  { %79 = dma.hbm_to_vmem [thread:$0]  %s72_s20, 2048, %s74_s22, [#allocation10], %s818_s29, %s818_s29, %s819_s30  }
  0x13   :  { %809 = dma.done.wait [#allocation4], 768  }
  0x14   :  { %810 = vsyncadd [#allocation4], 4294966528 }
  0x15   :  { %811 = dma.done.wait [#allocation7], 12544  }
  0x16   :  { %812 = vsyncadd [#allocation7], 4294954752 }
  0x17   :  { %813 = dma.done.wait [#allocation10], 8192  }
  0x18   :  { %814 = vsyncadd [#allocation10], 4294959104  ;;  %v131_v0 = vld [vmem:[#allocation6 + $0x78] sm:$0xff]  ;;  %v130_v1 = vld [vmem:[#allocation6 + $0x70] sm:$0xff] }
  0x19   :  { %v147_v2 = vld [vmem:[#allocation6 + $0xf8] sm:$0xff]  ;;  %247 = vmatpush.msra.mxu0 %v131_v0  ;;  %v146_v3 = vld [vmem:[#allocation6 + $0xf0] sm:$0xff]  ;;  %v129_v4 = vld [vmem:[#allocation6 + $0x68] sm:$0xff] }
  0x1a   :  { %267 = vmatpush.msra.mxu1 %v147_v2  ;;  %v145_v5 = vld [vmem:[#allocation6 + $0xe8] sm:$0xff]  ;;  %v128_v6 = vld [vmem:[#allocation6 + $0x60] sm:$0xff]  ;;  %v127_v8 = vld [vmem:[#allocation6 + $0x58] sm:$0xff] }
  0x1b   :  { %248 = vmatpush.msra.mxu0 %v130_v1  ;;  %v144_v7 = vld [vmem:[#allocation6 + $0xe0] sm:$0xff]  ;;  %v143_v9 = vld [vmem:[#allocation6 + $0xd8] sm:$0xff]  ;;  %v162_v11 = vld [vmem:[#allocation6 + $0x170] sm:$0xff] }
  0x1c   :  { %268 = vmatpush.msra.mxu1 %v146_v3  ;;  %v163_v10 = vld [vmem:[#allocation6 + $0x178] sm:$0xff]  ;;  %v126_v13 = vld [vmem:[#allocation6 + $0x50] sm:$0xff]  ;;  %v161_v15 = vld [vmem:[#allocation6 + $0x168] sm:$0xff] }
  0x1d   :  { %249 = vmatpush.msra.mxu0 %v129_v4  ;;  %v179_v12 = vld [vmem:[#allocation6 + $0x1f8] sm:$0xff]  ;;  %v142_v14 = vld [vmem:[#allocation6 + $0xd0] sm:$0xff]  ;;  %287 = vmatpush.msra.mxu2 %v163_v10  ;;  %v125_v17 = vld [vmem:[#allocation6 + $0x48] sm:$0xff] }
  0x1e   :  { %269 = vmatpush.msra.mxu1 %v145_v5  ;;  %307 = vmatpush.msra.mxu3 %v179_v12  ;;  %v178_v16 = vld [vmem:[#allocation6 + $0x1f0] sm:$0xff]  ;;  %v141_v18 = vld [vmem:[#allocation6 + $0xc8] sm:$0xff]  ;;  %v160_v20 = vld [vmem:[#allocation6 + $0x160] sm:$0xff] }
  0x1f   :  { %250 = vmatpush.msra.mxu0 %v128_v6  ;;  %288 = vmatpush.msra.mxu2 %v162_v11  ;;  %v177_v19 = vld [vmem:[#allocation6 + $0x1e8] sm:$0xff]  ;;  %v176_v21 = vld [vmem:[#allocation6 + $0x1e0] sm:$0xff]  ;;  %v159_v24 = vld [vmem:[#allocation6 + $0x158] sm:$0xff] }
  0x20   :  { %270 = vmatpush.msra.mxu1 %v144_v7  ;;  %308 = vmatpush.msra.mxu3 %v178_v16  ;;  %v124_v22 = vld [vmem:[#allocation6 + $0x40] sm:$0xff]  ;;  %v175_v25 = vld [vmem:[#allocation6 + $0x1d8] sm:$0xff]  ;;  %v158_v28 = vld [vmem:[#allocation6 + $0x150] sm:$0xff] }
  0x21   :  { %251 = vmatpush.msra.mxu0 %v127_v8  ;;  %v140_v23 = vld [vmem:[#allocation6 + $0xc0] sm:$0xff]  ;;  %289 = vmatpush.msra.mxu2 %v161_v15  ;;  %v123_v26 = vld [vmem:[#allocation6 + $0x38] sm:$0xff]  ;;  %v174_v29 = vld [vmem:[#allocation6 + $0x1d0] sm:$0xff] }
  0x22   :  { %271 = vmatpush.msra.mxu1 %v143_v9  ;;  %309 = vmatpush.msra.mxu3 %v177_v19  ;;  %v139_v27 = vld [vmem:[#allocation6 + $0xb8] sm:$0xff]  ;;  %v122_v30 = vld [vmem:[#allocation6 + $0x30] sm:$0xff]  ;;  %v157_v32 = vld [vmem:[#allocation6 + $0x148] sm:$0xff] }
  0x23   :  { %252 = vmatpush.msra.mxu0 %v126_v13  ;;  %290 = vmatpush.msra.mxu2 %v160_v20  ;;  %v138_v31 = vld [vmem:[#allocation6 + $0xb0] sm:$0xff]  ;;  %v173_v33 = vld [vmem:[#allocation6 + $0x1c8] sm:$0xff]  ;;  %v156_v36 = vld [vmem:[#allocation6 + $0x140] sm:$0xff] }
  0x24   :  { %272 = vmatpush.msra.mxu1 %v142_v14  ;;  %310 = vmatpush.msra.mxu3 %v176_v21  ;;  %v121_v34 = vld [vmem:[#allocation6 + $0x28] sm:$0xff]  ;;  %v172_v37 = vld [vmem:[#allocation6 + $0x1c0] sm:$0xff]  ;;  %v155_v40 = vld [vmem:[#allocation6 + $0x138] sm:$0xff] }
  0x25   :  { %253 = vmatpush.msra.mxu0 %v125_v17  ;;  %291 = vmatpush.msra.mxu2 %v159_v24  ;;  %v137_v35 = vld [vmem:[#allocation6 + $0xa8] sm:$0xff]  ;;  %v120_v38 = vld [vmem:[#allocation6 + $0x20] sm:$0xff]  ;;  %v171_v41 = vld [vmem:[#allocation6 + $0x1b8] sm:$0xff] }
  0x26   :  { %273 = vmatpush.msra.mxu1 %v141_v18  ;;  %311 = vmatpush.msra.mxu3 %v175_v25  ;;  %v136_v39 = vld [vmem:[#allocation6 + $0xa0] sm:$0xff]  ;;  %v119_v42 = vld [vmem:[#allocation6 + $0x18] sm:$0xff]  ;;  %v154_v44 = vld [vmem:[#allocation6 + $0x130] sm:$0xff] }
  0x27   :  { %254 = vmatpush.msra.mxu0 %v124_v22  ;;  %292 = vmatpush.msra.mxu2 %v158_v28  ;;  %v135_v43 = vld [vmem:[#allocation6 + $0x98] sm:$0xff]  ;;  %v170_v45 = vld [vmem:[#allocation6 + $0x1b0] sm:$0xff]  ;;  %v117_v48 = vld [vmem:[#allocation6 + $0x8] sm:$0xff] }
  0x28   :  { %274 = vmatpush.msra.mxu1 %v140_v23  ;;  %312 = vmatpush.msra.mxu3 %v174_v29  ;;  %v118_v46 = vld [vmem:[#allocation6 + $0x10] sm:$0xff]  ;;  %v153_v49 = vld [vmem:[#allocation6 + $0x128] sm:$0xff]  ;;  %v116_v51 = vld [vmem:[#allocation6] sm:$0xff] }
  0x29   :  { %255 = vmatpush.msra.mxu0 %v123_v26  ;;  %293 = vmatpush.msra.mxu2 %v157_v32  ;;  %v134_v47 = vld [vmem:[#allocation6 + $0x90] sm:$0xff]  ;;  %v169_v50 = vld [vmem:[#allocation6 + $0x1a8] sm:$0xff]  ;;  %v152_v53 = vld [vmem:[#allocation6 + $0x120] sm:$0xff] }
  0x2a   :  { %275 = vmatpush.msra.mxu1 %v139_v27  ;;  %313 = vmatpush.msra.mxu3 %v173_v33  ;;  %v133_v52 = vld [vmem:[#allocation6 + $0x88] sm:$0xff]  ;;  %v168_v54 = vld [vmem:[#allocation6 + $0x1a0] sm:$0xff]  ;;  %v107_v55 = vld [vmem:[#allocation3] sm:$0xff] }
  0x2b   :  { %256 = vmatpush.msra.mxu0 %v122_v30  ;;  %294 = vmatpush.msra.mxu2 %v156_v36  ;;  %v109_v56 = vld [vmem:[#allocation3 + $0xc] sm:$0xff]  ;;  %v111_v58 = vld [vmem:[#allocation3 + $0x18] sm:$0xff]  ;;  %v113_v59 = vld [vmem:[#allocation3 + $0x24] sm:$0xff]  ;;  %220 = vst [vmem:[#allocation1] ss:$4 sm:$0xff] %v107_v55 }
  0x2c   :  { %276 = vmatpush.msra.mxu1 %v138_v31  ;;  %314 = vmatpush.msra.mxu3 %v172_v37  ;;  %v132_v57 = vld [vmem:[#allocation6 + $0x80] sm:$0xff]  ;;  %v195_v60 = vld [vmem:[#allocation6 + $0x278] sm:$0xff]  ;;  %222 = vst [vmem:[#allocation1 + $0x1] ss:$4 sm:$0xff] %v109_v56  ;;  %v194_v0 = vld [vmem:[#allocation6 + $0x270] sm:$0xff] }
  0x2d   :  { %257 = vmatpush.msra.mxu0 %v121_v34  ;;  %295 = vmatpush.msra.mxu2 %v155_v40  ;;  %v211_v61 = vld [vmem:[#allocation6 + $0x2f8] sm:$0xff]  ;;  %224 = vst [vmem:[#allocation1 + $0x2] ss:$4 sm:$0xff] %v111_v58  ;;  %v193_v1 = vld [vmem:[#allocation6 + $0x268] sm:$0xff]  ;;  %v210_v2 = vld [vmem:[#allocation6 + $0x2f0] sm:$0xff] }
  0x2e   :  { %277 = vmatpush.msra.mxu1 %v137_v35  ;;  %315 = vmatpush.msra.mxu3 %v171_v41  ;;  %v151_v62 = vld [vmem:[#allocation6 + $0x118] sm:$0xff]  ;;  %226 = vst [vmem:[#allocation1 + $0x3] ss:$4 sm:$0xff] %v113_v59  ;;  %v209_v3 = vld [vmem:[#allocation6 + $0x2e8] sm:$0xff]  ;;  %v150_v4 = vld [vmem:[#allocation6 + $0x110] sm:$0xff] }
  0x2f   :  { %258 = vmatpush.msra.mxu0 %v120_v38  ;;  %296 = vmatpush.msra.mxu2 %v154_v44  ;;  %v167_v63 = vld [vmem:[#allocation6 + $0x198] sm:$0xff]  ;;  %v166_v5 = vld [vmem:[#allocation6 + $0x190] sm:$0xff]  ;;  %v110_v7 = vld [vmem:[#allocation3 + $0x14] sm:$0xf] }
  0x30   :  { %278 = vmatpush.msra.mxu1 %v136_v39  ;;  %316 = vmatpush.msra.mxu3 %v170_v45  ;;  %v108_v6 = vld [vmem:[#allocation3 + $0x8] sm:$0xf]  ;;  %v112_v8 = vld [vmem:[#allocation3 + $0x20] sm:$0xf]  ;;  %v149_v9 = vld [vmem:[#allocation6 + $0x108] sm:$0xff] }
  0x31   :  { %259 = vmatpush.msra.mxu0 %v119_v42  ;;  %297 = vmatpush.msra.mxu2 %v153_v49  ;;  %v165_v10 = vld [vmem:[#allocation6 + $0x188] sm:$0xff]  ;;  %v114_v11 = vld [vmem:[#allocation3 + $0x2c] sm:$0xf]  ;;  %228 = vst [vmem:[#allocation1 + $0x20] ss:$4 sm:$0xff] %v108_v6  ;;  %v192_v12 = vld [vmem:[#allocation6 + $0x260] sm:$0xff] }
  0x32   :  { %279 = vmatpush.msra.mxu1 %v135_v43  ;;  %317 = vmatpush.msra.mxu3 %v169_v50  ;;  %v191_v13 = vld [vmem:[#allocation6 + $0x258] sm:$0xff]  ;;  %v208_v14 = vld [vmem:[#allocation6 + $0x2e0] sm:$0xff]  ;;  %230 = vst [vmem:[#allocation1 + $0x21] ss:$4 sm:$0xff] %v110_v7  ;;  %v190_v18 = vld [vmem:[#allocation6 + $0x250] sm:$0xff] }
  0x33   :  { %260 = vmatpush.msra.mxu0 %v118_v46  ;;  %298 = vmatpush.msra.mxu2 %v152_v53  ;;  %v207_v15 = vld [vmem:[#allocation6 + $0x2d8] sm:$0xff]  ;;  %v148_v16 = vld [vmem:[#allocation6 + $0x100] sm:$0xff]  ;;  %232 = vst [vmem:[#allocation1 + $0x22] ss:$4 sm:$0xff] %v112_v8  ;;  %v206_v19 = vld [vmem:[#allocation6 + $0x2d0] sm:$0xff] }
  0x34   :  { %280 = vmatpush.msra.mxu1 %v134_v47  ;;  %318 = vmatpush.msra.mxu3 %v168_v54  ;;  %v164_v17 = vld [vmem:[#allocation6 + $0x180] sm:$0xff]  ;;  %234 = vst [vmem:[#allocation1 + $0x23] ss:$4 sm:$0xff] %v114_v11  ;;  %v189_v22 = vld [vmem:[#allocation6 + $0x248] sm:$0xff]  ;;  %v187_v30 = vld [vmem:[#allocation6 + $0x238] sm:$0xff] }
  0x35   :  { %261 = vmatpush.msra.mxu0 %v117_v48  ;;  %299 = vmatpush.msra.mxu2 %v151_v62  ;;  %v237_v20 = vld.sshfl [vmem:[#allocation1 + $0x10] sm:$0xff pattern:$0x73625140]  ;;  %v238_v21 = vld.sshfl [vmem:[#allocation1 + $0x18] sm:$0xff pattern:$0x73625140] }
  0x36   :  { %281 = vmatpush.msra.mxu1 %v133_v52  ;;  %319 = vmatpush.msra.mxu3 %v167_v63  ;;  %v205_v23 = vld [vmem:[#allocation6 + $0x2c8] sm:$0xff]  ;;  %v236_v25 = vld.sshfl [vmem:[#allocation1 + $0x8] sm:$0xff pattern:$0x73625140]  ;;  %v188_v27 = vld [vmem:[#allocation6 + $0x240] sm:$0xff] }
  0x37   :  { %262 = vmatpush.msra.mxu0 %v116_v51  ;;  %300 = vmatpush.msra.mxu2 %v150_v4  ;;  %v235_v24 = vld.sshfl [vmem:[#allocation1] sm:$0xff pattern:$0x73625140]  ;;  %v204_v28 = vld [vmem:[#allocation6 + $0x2c0] sm:$0xff]  ;;  %v203_v31 = vld [vmem:[#allocation6 + $0x2b8] sm:$0xff] }
  0x38   :  { %282 = vmatpush.msra.mxu1 %v132_v57  ;;  %320 = vmatpush.msra.mxu3 %v166_v5  ;;  %v392_v26 = vld [vmem:[#allocation9 + $0x78] sm:$0xff]  ;;  %v391_v29 = vld [vmem:[#allocation9 + $0x70] sm:$0xff]  ;;  %v390_v32 = vld [vmem:[#allocation9 + $0x68] sm:$0xff] }
  0x39   :  { %327 = vmatpush.msrb.mxu0 %v195_v60  ;;  %301 = vmatpush.msra.mxu2 %v149_v9  ;;  %v186_v33 = vld [vmem:[#allocation6 + $0x230] sm:$0xff]  ;;  %v185_v36 = vld [vmem:[#allocation6 + $0x228] sm:$0xff]  ;;  %v184_v39 = vld [vmem:[#allocation6 + $0x220] sm:$0xff] }
  0x3a   :  { %347 = vmatpush.msrb.mxu1 %v211_v61  ;;  %321 = vmatpush.msra.mxu3 %v165_v10  ;;  %v202_v34 = vld [vmem:[#allocation6 + $0x2b0] sm:$0xff]  ;;  %v201_v37 = vld [vmem:[#allocation6 + $0x2a8] sm:$0xff]  ;;  %v200_v40 = vld [vmem:[#allocation6 + $0x2a0] sm:$0xff] }
  0x3b   :  { %328 = vmatpush.msrb.mxu0 %v194_v0  ;;  %302 = vmatpush.msra.mxu2 %v148_v16  ;;  %v389_v35 = vld [vmem:[#allocation9 + $0x60] sm:$0xff]  ;;  %v388_v38 = vld [vmem:[#allocation9 + $0x58] sm:$0xff]  ;;  %v387_v41 = vld [vmem:[#allocation9 + $0x50] sm:$0xff] }
  0x3c   :  { %348 = vmatpush.msrb.mxu1 %v210_v2  ;;  %322 = vmatpush.msra.mxu3 %v164_v17  ;;  %v183_v42 = vld [vmem:[#allocation6 + $0x218] sm:$0xff]  ;;  %v182_v45 = vld [vmem:[#allocation6 + $0x210] sm:$0xff]  ;;  %v181_v47 = vld [vmem:[#allocation6 + $0x208] sm:$0xff] }
  0x3d   :  { %329 = vmatpush.msrb.mxu0 %v193_v1  ;;  %303 = vmatmul.f32.vlgmr.msra.gmra.mxu2 %v237_v20  ;;  %v199_v43 = vld [vmem:[#allocation6 + $0x298] sm:$0xff]  ;;  %v198_v46 = vld [vmem:[#allocation6 + $0x290] sm:$0xff]  ;;  %v197_v48 = vld [vmem:[#allocation6 + $0x288] sm:$0xff] }
  0x3e   :  { %349 = vmatpush.msrb.mxu1 %v209_v3  ;;  %323 = vmatmul.f32.vlgmr.msra.gmra.mxu3 %v238_v21  ;;  %v386_v44 = vld [vmem:[#allocation9 + $0x48] sm:$0xff]  ;;  %v180_v49 = vld [vmem:[#allocation6 + $0x200] sm:$0xff]  ;;  %v239_v51 = vld.sshfl [vmem:[#allocation1 + $0x20] sm:$0xff pattern:$0x73625140] }
  0x3f   :  { %330 = vmatpush.msrb.mxu0 %v192_v12  ;;  %283 = vmatmul.f32.vlgmr.msra.gmra.mxu1 %v236_v25  ;;  %v196_v50 = vld [vmem:[#allocation6 + $0x280] sm:$0xff]  ;;  %v240_v52 = vld.sshfl [vmem:[#allocation1 + $0x28] sm:$0xff pattern:$0x73625140]  ;;  %v384_v54 = vld [vmem:[#allocation9 + $0x38] sm:$0xff] }
  0x40   :  { %350 = vmatpush.msrb.mxu1 %v208_v14  ;;  %263 = vmatmul.f32.vlgmr.msra.gmra.mxu0 %v235_v24  ;;  %v385_v53 = vld [vmem:[#allocation9 + $0x40] sm:$0xff]  ;;  %v383_v55 = vld [vmem:[#allocation9 + $0x30] sm:$0xff]  ;;  %v382_v56 = vld [vmem:[#allocation9 + $0x28] sm:$0xff] }
  0x41   :  { %331 = vmatpush.msrb.mxu0 %v191_v13  ;;  %395 = vmatpush.msrb.mxu2 %v392_v26  ;;  %v381_v57 = vld [vmem:[#allocation9 + $0x20] sm:$0xff]  ;;  %v380_v58 = vld [vmem:[#allocation9 + $0x18] sm:$0xff]  ;;  %v379_v59 = vld [vmem:[#allocation9 + $0x10] sm:$0xff] }
  0x42   :  { %351 = vmatpush.msrb.mxu1 %v207_v15  ;;  %v378_v60 = vld [vmem:[#allocation9 + $0x8] sm:$0xff]  ;;  %v377_v61 = vld [vmem:[#allocation9] sm:$0xff]  ;;  %v648_v8 = vld [vmem:[#allocation8] ss:$0 sm:$0xff] }
  0x43   :  { %332 = vmatpush.msrb.mxu0 %v190_v18  ;;  %396 = vmatpush.msrb.mxu2 %v391_v29  ;;  %v649_v12 = vld [vmem:[#allocation8 + $0x1] ss:$0 sm:$0xff]  ;;  %v458_v15 = vld [vmem:[#allocation9 + $0xf8] sm:$0xff]  ;;  %v456_v21 = vld [vmem:[#allocation9 + $0xe8] sm:$0xff] }
  0x44   :  { %352 = vmatpush.msrb.mxu1 %v206_v19  ;;  %461 = vmatpush.msrb.mxu3 %v458_v15  ;;  %v457_v20 = vld [vmem:[#allocation9 + $0xf0] sm:$0xff]  ;;  %v452_v25 = vld [vmem:[#allocation9 + $0xc8] sm:$0xff]  ;;  %v451_v26 = vld [vmem:[#allocation9 + $0xc0] sm:$0xff] }
  0x45   :  { %333 = vmatpush.msrb.mxu0 %v189_v22  ;;  %397 = vmatpush.msrb.mxu2 %v390_v32  ;;  %v455_v22 = vld [vmem:[#allocation9 + $0xe0] sm:$0xff]  ;;  %v453_v24 = vld [vmem:[#allocation9 + $0xd0] sm:$0xff]  ;;  %v448_v29 = vld [vmem:[#allocation9 + $0xa8] sm:$0xff] }
  0x46   :  { %353 = vmatpush.msrb.mxu1 %v205_v23  ;;  %462 = vmatpush.msrb.mxu3 %v457_v20  ;;  %v454_v23 = vld [vmem:[#allocation9 + $0xd8] sm:$0xff]  ;;  %v445_v32 = vld [vmem:[#allocation9 + $0x90] sm:$0xff] }
  0x47   :  { %334 = vmatpush.msrb.mxu0 %v188_v27  ;;  %398 = vmatpush.msrb.mxu2 %v389_v35  ;;  %v450_v27 = vld [vmem:[#allocation9 + $0xb8] sm:$0xff] }
  0x48   :  { %354 = vmatpush.msrb.mxu1 %v204_v28  ;;  %463 = vmatpush.msrb.mxu3 %v456_v21  ;;  %v449_v28 = vld [vmem:[#allocation9 + $0xb0] sm:$0xff] }
  0x49   :  { %335 = vmatpush.msrb.mxu0 %v187_v30  ;;  %399 = vmatpush.msrb.mxu2 %v388_v38  ;;  %v447_v30 = vld [vmem:[#allocation9 + $0xa0] sm:$0xff] }
  0x4a   :  { %355 = vmatpush.msrb.mxu1 %v203_v31  ;;  %464 = vmatpush.msrb.mxu3 %v455_v22  ;;  %v446_v31 = vld [vmem:[#allocation9 + $0x98] sm:$0xff] }
  0x4b   :  { %336 = vmatpush.msrb.mxu0 %v186_v33  ;;  %400 = vmatpush.msrb.mxu2 %v387_v41  ;;  %v444_v33 = vld [vmem:[#allocation9 + $0x88] sm:$0xff]  ;;  %v654_v22 = vld [vmem:[#allocation8 + $0x8] ss:$0 sm:$0xff] }
  0x4c   :  { %356 = vmatpush.msrb.mxu1 %v202_v34  ;;  %465 = vmatpush.msrb.mxu3 %v454_v23  ;;  %v443_v34 = vld [vmem:[#allocation9 + $0x80] sm:$0xff] }
  0x4d   :  { %337 = vmatpush.msrb.mxu0 %v185_v36  ;;  %401 = vmatpush.msrb.mxu2 %v386_v44  ;;  %v650_v44 = vld [vmem:[#allocation8 + $0x4] ss:$0 sm:$0xff] }
  0x4e   :  { %357 = vmatpush.msrb.mxu1 %v201_v37  ;;  %466 = vmatpush.msrb.mxu3 %v453_v24 }
  0x4f   :  { %338 = vmatpush.msrb.mxu0 %v184_v39  ;;  %402 = vmatpush.msrb.mxu2 %v385_v53 }
  0x50   :  { %358 = vmatpush.msrb.mxu1 %v200_v40  ;;  %467 = vmatpush.msrb.mxu3 %v452_v25 }
  0x51   :  { %339 = vmatpush.msrb.mxu0 %v183_v42  ;;  %403 = vmatpush.msrb.mxu2 %v384_v54  ;;  %v524_v54 = vld [vmem:[#allocation9 + $0x178] sm:$0xff] }
  0x52   :  { %359 = vmatpush.msrb.mxu1 %v199_v43  ;;  %468 = vmatpush.msrb.mxu3 %v451_v26  ;;  %v655_v26 = vld [vmem:[#allocation8 + $0x3] ss:$0 sm:$0xff] }
  0x53   :  { %340 = vmatpush.msrb.mxu0 %v182_v45  ;;  %404 = vmatpush.msrb.mxu2 %v383_v55 }
  0x54   :  { %360 = vmatpush.msrb.mxu1 %v198_v46  ;;  %469 = vmatpush.msrb.mxu3 %v450_v27 }
  0x55   :  { %341 = vmatpush.msrb.mxu0 %v181_v47  ;;  %405 = vmatpush.msrb.mxu2 %v382_v56  ;;  %v651_v47 = vld [vmem:[#allocation8 + $0x7] ss:$0 sm:$0xff] }
  0x56   :  { %361 = vmatpush.msrb.mxu1 %v197_v48  ;;  %470 = vmatpush.msrb.mxu3 %v449_v28 }
  0x57   :  { %342 = vmatpush.msrb.mxu0 %v180_v49  ;;  %406 = vmatpush.msrb.mxu2 %v381_v57 }
  0x58   :  { %362 = vmatpush.msrb.mxu1 %v196_v50  ;;  %343 = vmatmul.f32.vlgmr.msrb.gmra.mxu0 %v239_v51  ;;  %v652_v51 = vld [vmem:[#allocation8 + $0x2] ss:$0 sm:$0xff] }
  0x59   :  { %363 = vmatmul.f32.vlgmr.msrb.gmra.mxu1 %v240_v52  ;;  %407 = vmatpush.msrb.mxu2 %v380_v58 }
  0x5a   :  { %471 = vmatpush.msrb.mxu3 %v448_v29  ;;  %527 = vmatpush.msra.mxu0 %v524_v54  ;;  %v589_v29 = vld [vmem:[#allocation11 + $0x78] sm:$0xff] }
  0x5b   :  { %408 = vmatpush.msrb.mxu2 %v379_v59  ;;  %v523_v59 = vld [vmem:[#allocation9 + $0x170] sm:$0xff]  ;;  %594 = vmatpush.msra.mxu1 %v589_v29 }
  0x5c   :  { %472 = vmatpush.msrb.mxu3 %v447_v30  ;;  %528 = vmatpush.msra.mxu0 %v523_v59 }
  0x5d   :  { %409 = vmatpush.msrb.mxu2 %v378_v60  ;;  %v522_v60 = vld [vmem:[#allocation9 + $0x168] sm:$0xff] }
  0x5e   :  { %473 = vmatpush.msrb.mxu3 %v446_v31  ;;  %529 = vmatpush.msra.mxu0 %v522_v60 }
  0x5f   :  { %410 = vmatpush.msrb.mxu2 %v377_v61  ;;  %v521_v61 = vld [vmem:[#allocation9 + $0x160] sm:$0xff] }
  0x60   :  { %474 = vmatpush.msrb.mxu3 %v445_v32  ;;  %530 = vmatpush.msra.mxu0 %v521_v61  ;;  %v657_v61 = vld [vmem:[#allocation8 + $0x9] ss:$0 sm:$0xff] }
  0x62   :  { %475 = vmatpush.msrb.mxu3 %v444_v33 }
  0x64   :  { %476 = vmatpush.msrb.mxu3 %v443_v34  ;;  %v588_v34 = vld [vmem:[#allocation11 + $0x70] sm:$0xff] }
  0x65   :  { %595 = vmatpush.msra.mxu1 %v588_v34 }
  0xbc   :  { %v284_v63 = vpop.f32.mrf.mxu1 }
  0xbd   :  { %v264_v62 = vpop.f32.mrf.mxu0 }
  0xbe   :  { %v285_v0 = vadd.f32 %v284_v63, %v264_v62  ;;  %v520_v62 = vld [vmem:[#allocation9 + $0x158] sm:$0xff]  ;;  %v519_v63 = vld [vmem:[#allocation9 + $0x150] sm:$0xff] }
  0xbf   :  { %531 = vmatpush.msra.mxu0 %v520_v62 }
  0xc0   :  { %v304_v1 = vpop.f32.mrf.mxu2 }
  0xc1   :  { %v305_v2 = vadd.f32 %v304_v1, %v285_v0  ;;  %v324_v3 = vpop.f32.mrf.mxu3  ;;  %532 = vmatpush.msra.mxu0 %v519_v63  ;;  %v518_v0 = vld [vmem:[#allocation9 + $0x148] sm:$0xff]  ;;  %v517_v1 = vld [vmem:[#allocation9 + $0x140] sm:$0xff] }
  0xc3   :  { %v325_v4 = vadd.f32 %v324_v3, %v305_v2  ;;  %533 = vmatpush.msra.mxu0 %v518_v0  ;;  %v516_v2 = vld [vmem:[#allocation9 + $0x138] sm:$0xff]  ;;  %v515_v3 = vld [vmem:[#allocation9 + $0x130] sm:$0xff] }
  0xc5   :  { %534 = vmatpush.msra.mxu0 %v517_v1  ;;  %v658_v1 = vld [vmem:[%s902_s5] ss:$0 sm:$0xff] }
  0xc7   :  { %535 = vmatpush.msra.mxu0 %v516_v2 }
  0xc9   :  { %536 = vmatpush.msra.mxu0 %v515_v3 }
  0xd5   :  { %v344_v5 = vpop.f32.mrf.mxu0 }
  0xd6   :  { %v364_v6 = vpop.f32.mrf.mxu1  ;;  %v345_v7 = vadd.f32 %v344_v5, %v325_v4  ;;  %v514_v4 = vld [vmem:[#allocation9 + $0x128] sm:$0xff]  ;;  %v513_v5 = vld [vmem:[#allocation9 + $0x120] sm:$0xff] }
  0xd7   :  { %537 = vmatpush.msra.mxu0 %v514_v4 }
  0xd8   :  { %v365_v9 = vadd.f32 %v364_v6, %v345_v7  ;;  %v512_v6 = vld [vmem:[#allocation9 + $0x118] sm:$0xff]  ;;  %v511_v7 = vld [vmem:[#allocation9 + $0x110] sm:$0xff] }
  0xd9   :  { %538 = vmatpush.msra.mxu0 %v513_v5 }
  0xda   :  { %v375_v10 = vadd.f32 %v648_v8, %v365_v9  ;;  %v510_v8 = vld [vmem:[#allocation9 + $0x108] sm:$0xff]  ;;  %v509_v9 = vld [vmem:[#allocation9 + $0x100] sm:$0xff] }
  0xdb   :  { %539 = vmatpush.msra.mxu0 %v512_v6 }
  0xdc   :  { %v376_v11 = vmax.f32 %v375_v10, 0.0 }
  0xdd   :  { %540 = vmatpush.msra.mxu0 %v511_v7 }
  0xde   :  { %411 = vmatmul.f32.vlgmr.msrb.gmra.mxu2 %v376_v11 }
  0xdf   :  { %541 = vmatpush.msra.mxu0 %v510_v8 }
  0xe1   :  { %542 = vmatpush.msra.mxu0 %v509_v9 }
 0x161   :  { %v412_v13 = vpop.f32.mrf.mxu2 }
 0x162   :  { %v413_v14 = vadd.f32 %v649_v12, %v412_v13 }
 0x164   :  { %415 = vadd.xlane.f32.xlu0 %v413_v14 }
 0x1d7   :  { %v416_v16 = vpop.xlane.xlu0 %415 }
 0x1d8   :  { %v417_v17 = vmul.f32 0.0078125, %v416_v16 }
 0x1da   :  { %v418_v18 = vsub.f32 %v413_v14, %v417_v17 }
 0x1dc   :  { %v419_v19 = vmul.f32 %v418_v18, %v418_v18 }
 0x1de   :  { %420 = vadd.xlane.f32.xlu0 %v419_v19  ;;  %v653_v19 = vld [vmem:[#allocation8 + $0x5] ss:$0 sm:$0xff] }
 0x251   :  { %v421_v35 = vpop.xlane.xlu0 %420 }
 0x252   :  { %v422_v36 = vmul.f32 0.0078125, %v421_v35  ;;  %v587_v35 = vld [vmem:[#allocation11 + $0x68] sm:$0xff] }
 0x253   :  { %596 = vmatpush.msra.mxu1 %v587_v35 }
 0x254   :  { %v423_v37 = vadd.f32 1e-05, %v422_v36  ;;  %v586_v36 = vld [vmem:[#allocation11 + $0x60] sm:$0xff] }
 0x255   :  { %597 = vmatpush.msra.mxu1 %v586_v36 }
 0x256   :  { %659 = vrsqrt.f32 %v423_v37  ;;  %vm430_vm1 = vweird.f32 %v423_v37 }
 0x25c   :  { %v660_v38 = vpop.eup %659 }
 0x25d   :  { %v425_v39 = vmul.f32 %v660_v38, %v423_v37  ;;  %vm431_vm0 = vweird.f32 %v660_v38  ;;  %v585_v37 = vld [vmem:[#allocation11 + $0x58] sm:$0xff] }
 0x25e   :  { %vm432_vm2 = vmor %vm430_vm1, %vm431_vm0  ;;  %598 = vmatpush.msra.mxu1 %v585_v37 }
 0x25f   :  { %v426_v40 = vmul.f32 %v660_v38, %v425_v39  ;;  %v583_v39 = vld [vmem:[#allocation11 + $0x48] sm:$0xff] }
 0x261   :  { %v427_v41 = vmul.f32 0.5, %v426_v40  ;;  %v582_v40 = vld [vmem:[#allocation11 + $0x40] sm:$0xff] }
 0x263   :  { %v428_v42 = vsub.f32 1.5, %v427_v41  ;;  %v581_v41 = vld [vmem:[#allocation11 + $0x38] sm:$0xff] }
 0x265   :  { %v429_v43 = vmul.f32 %v660_v38, %v428_v42  ;;  %v580_v42 = vld [vmem:[#allocation11 + $0x30] sm:$0xff] }
 0x267   :  { %v433_v45 = vsel %vm432_vm2, %v660_v38, %v429_v43  ;;  %v584_v38 = vld [vmem:[#allocation11 + $0x50] sm:$0xff]  ;;  %v579_v43 = vld [vmem:[#allocation11 + $0x28] sm:$0xff] }
 0x268   :  { %v434_v46 = vmul.f32 %v433_v45, %v418_v18  ;;  %599 = vmatpush.msra.mxu1 %v584_v38  ;;  %v577_v45 = vld [vmem:[#allocation11 + $0x18] sm:$0xff] }
 0x26a   :  { %v438_v48 = vmul.f32 %v650_v44, %v434_v46  ;;  %600 = vmatpush.msra.mxu1 %v583_v39  ;;  %v578_v44 = vld [vmem:[#allocation11 + $0x20] sm:$0xff]  ;;  %v576_v46 = vld [vmem:[#allocation11 + $0x10] sm:$0xff] }
 0x26c   :  { %v440_v49 = vadd.f32 %v651_v47, %v438_v48  ;;  %601 = vmatpush.msra.mxu1 %v582_v40  ;;  %v575_v47 = vld [vmem:[#allocation11 + $0x8] sm:$0xff]  ;;  %v574_v48 = vld [vmem:[#allocation11] sm:$0xff] }
 0x26e   :  { %v441_v50 = vmax.f32 %v440_v49, 0.0  ;;  %602 = vmatpush.msra.mxu1 %v581_v41 }
 0x270   :  { %477 = vmatmul.f32.vlgmr.msrb.gmra.mxu3 %v441_v50  ;;  %603 = vmatpush.msra.mxu1 %v580_v42 }
 0x272   :  { %604 = vmatpush.msra.mxu1 %v579_v43 }
 0x274   :  { %605 = vmatpush.msra.mxu1 %v578_v44 }
 0x276   :  { %606 = vmatpush.msra.mxu1 %v577_v45 }
 0x278   :  { %607 = vmatpush.msra.mxu1 %v576_v46 }
 0x27a   :  { %608 = vmatpush.msra.mxu1 %v575_v47 }
 0x27c   :  { %609 = vmatpush.msra.mxu1 %v574_v48 }
 0x2f3   :  { %v478_v52 = vpop.f32.mrf.mxu3 }
 0x2f4   :  { %v479_v53 = vadd.f32 %v652_v51, %v478_v52 }
 0x2f6   :  { %481 = vadd.xlane.f32.xlu1 %v479_v53 }
 0x369   :  { %v482_v55 = vpop.xlane.xlu1 %481 }
 0x36a   :  { %v483_v56 = vmul.f32 0.0078125, %v482_v55 }
 0x36c   :  { %v484_v57 = vsub.f32 %v479_v53, %v483_v56 }
 0x36e   :  { %v485_v58 = vmul.f32 %v484_v57, %v484_v57 }
 0x370   :  { %486 = vadd.xlane.f32.xlu1 %v485_v58  ;;  %v656_v58 = vld [vmem:[#allocation8 + $0x6] ss:$0 sm:$0xff] }
 0x3e3   :  { %v487_v10 = vpop.xlane.xlu1 %486 }
 0x3e4   :  { %v488_v11 = vmul.f32 0.0078125, %v487_v10 }
 0x3e6   :  { %v489_v12 = vadd.f32 1e-05, %v488_v11 }
 0x3e8   :  { %661 = vrsqrt.f32 %v489_v12  ;;  %vm496_vm4 = vweird.f32 %v489_v12 }
 0x3ee   :  { %v662_v13 = vpop.eup %661 }
 0x3ef   :  { %v491_v14 = vmul.f32 %v662_v13, %v489_v12  ;;  %vm497_vm3 = vweird.f32 %v662_v13 }
 0x3f0   :  { %vm498_vm5 = vmor %vm496_vm4, %vm497_vm3 }
 0x3f1   :  { %v492_v15 = vmul.f32 %v662_v13, %v491_v14 }
 0x3f3   :  { %v493_v16 = vmul.f32 0.5, %v492_v15 }
 0x3f5   :  { %v494_v17 = vsub.f32 1.5, %v493_v16 }
 0x3f7   :  { %v495_v18 = vmul.f32 %v662_v13, %v494_v17 }
 0x3f9   :  { %v499_v20 = vsel %vm498_vm5, %v662_v13, %v495_v18 }
 0x3fa   :  { %v500_v21 = vmul.f32 %v499_v20, %v484_v57 }
 0x3fc   :  { %v504_v23 = vmul.f32 %v653_v19, %v500_v21 }
 0x3fe   :  { %v506_v24 = vadd.f32 %v654_v22, %v504_v23 }
 0x400   :  { %v507_v25 = vmax.f32 %v506_v24, 0.0 }
 0x402   :  { %543 = vmatmul.f32.vlgmr.msra.gmra.mxu0 %v507_v25 }
 0x47f   :  { %v544_v27 = vpop.f32.mrf.mxu0 }
 0x480   :  { %v545_v28 = vadd.f32 %v655_v26, %v544_v27 }
 0x482   :  { %547 = vadd.xlane.f32.xlu2 %v545_v28 }
 0x4f5   :  { %v548_v30 = vpop.xlane.xlu2 %547 }
 0x4f6   :  { %v549_v31 = vmul.f32 0.0078125, %v548_v30 }
 0x4f8   :  { %v550_v32 = vsub.f32 %v545_v28, %v549_v31 }
 0x4fa   :  { %v551_v33 = vmul.f32 %v550_v32, %v550_v32 }
 0x4fc   :  { %552 = vadd.xlane.f32.xlu2 %v551_v33 }
 0x56f   :  { %v553_v49 = vpop.xlane.xlu2 %552 }
 0x570   :  { %v554_v50 = vmul.f32 0.0078125, %v553_v49 }
 0x572   :  { %v555_v51 = vadd.f32 1e-05, %v554_v50 }
 0x574   :  { %663 = vrsqrt.f32 %v555_v51  ;;  %vm562_vm7 = vweird.f32 %v555_v51 }
 0x57a   :  { %v664_v52 = vpop.eup %663 }
 0x57b   :  { %v557_v53 = vmul.f32 %v664_v52, %v555_v51  ;;  %vm563_vm6 = vweird.f32 %v664_v52 }
 0x57c   :  { %vm564_vm8 = vmor %vm562_vm7, %vm563_vm6 }
 0x57d   :  { %v558_v54 = vmul.f32 %v664_v52, %v557_v53 }
 0x57f   :  { %v559_v55 = vmul.f32 0.5, %v558_v54 }
 0x581   :  { %v560_v56 = vsub.f32 1.5, %v559_v55 }
 0x583   :  { %v561_v57 = vmul.f32 %v664_v52, %v560_v56 }
 0x585   :  { %v565_v59 = vsel %vm564_vm8, %v664_v52, %v561_v57 }
 0x586   :  { %v566_v60 = vmul.f32 %v565_v59, %v550_v32 }
 0x588   :  { %v570_v62 = vmul.f32 %v656_v58, %v566_v60 }
 0x58a   :  { %v572_v63 = vadd.f32 %v657_v61, %v570_v62 }
 0x58c   :  { %v573_v0 = vmax.f32 %v572_v63, 0.0 }
 0x58e   :  { %610 = vmatmul.f32.vlgmr.msra.gmra.mxu1 %v573_v0 }
 0x60b   :  { %v611_v2 = vpop.f32.mrf.mxu1 }
 0x60c   :  { %v612_v3 = vadd.f32 %v658_v1, %v611_v2 }
 0x60e   :  { %614 = vst [vmem:[#allocation12] sm:$0xff] %v612_v3 }
 0x60f   :  { %618 = vsyncadd [#allocation5], 96  ;;  %s621_s25 = sshll.u32 %s903_s6, 4  ;;  %s826_s26 = smov [#allocation12]   ;;  %s622_s25 = int_to_ptr.hbm [resolvable:$true] %s621_s25 }
 0x610   :  { %s619_s27 = sshll.u32 %s826_s26, 4  ;;  %s827_s28 = smov 32   ;;  %s620_s27 = int_to_ptr.vmem [resolvable:$true] %s619_s27 }
 0x611   :  { %s828_s29 = smov 2  }
 0x612   :  { %627 = dma.vmem_to_hbm [thread:$0]  %s620_s27, 32, %s622_s25, [#allocation5], %s827_s28, %s827_s28, %s828_s29  }
 0x613   :  { %815 = dma.done.wait [#allocation5], 128  }
 0x614   :  { %816 = vsyncadd [#allocation5], 4294967168 }
 0x615   :  { %632 = vsyncpa [#allocation4], 1 }
 0x616   :  { %633 = vsyncpa [#allocation7], 1 }
 0x617   :  { %634 = vsyncpa [#allocation10], 1 }
 0x618   :  { %635 = vsyncpa [#allocation5], 1 }

</bundles_post_ra>
